<compile_context>
chip_gen: v7x
topology: tpu7x:2x2x1
jax: 0.10.0
libtpu: 0.0.40
codegen_flags: <defaults>
</compile_context>

<pallas_src>
import functools

import jax
import jax.numpy as jnp
from jax import lax
from jax.experimental import pallas as pl
from jax.experimental.pallas import tpu as pltpu

EPS = 1e-5


def conv_stats_kernel(w_ref, cols_ref, y_ref, s1_ref, s2_ref):
    """Pass 1: conv as GEMM (low-precision in, f32 acc) + per-channel sum/sumsq."""
    j = pl.program_id(0)

    y = jnp.dot(w_ref[...], cols_ref[...],
                preferred_element_type=jnp.float32,
                precision=jax.lax.Precision.HIGHEST)      # (Cout, col_tile) f32
    y_ref[...] = y

    @pl.when(j == 0)
    def _():
        s1_ref[...] = jnp.zeros_like(s1_ref)
        s2_ref[...] = jnp.zeros_like(s2_ref)

    # Padded columns are exact zeros -> contribute nothing to either sum.
    s1_ref[...] += jnp.sum(y, axis=1, keepdims=True)
    s2_ref[...] += jnp.sum(y * y, axis=1, keepdims=True)


def bn_relu_kernel(y_ref, s1_ref, s2_ref, p_ref, o_ref, *, inv_count):
    """Pass 2: folded BatchNorm (per-channel scale/shift) + ReLU."""
    mean = s1_ref[...] * inv_count                                  # (Cout, 1)
    var = jnp.maximum(s2_ref[...] * inv_count - mean * mean, 0.0)   # biased var
    gamma = p_ref[:, 0:1]
    beta = p_ref[:, 1:2]
    scale = gamma * lax.rsqrt(var + EPS)                            # (Cout, 1)
    shift = beta - mean * scale
    o_ref[...] = jnp.maximum(y_ref[...] * scale + shift, 0.0)


def conv_layer_forward(x, w, b, gamma, beta, *,
                       matmul_dtype=jnp.bfloat16, col_tile=128):
    # Conv bias cancels exactly under training-mode BatchNorm (mean subtraction),
    # so it is dead work for the kernel output.
    del b
    # TODO(synk): running_mean/running_var momentum updates (PyTorch training
    # side effects) are not materialized; if added, the mean must include the bias
    # and the running_var must use the unbiased estimate.
    N, Cin, L = x.shape
    Cout, _, K = w.shape
    Lout = L - K + 1
    CinK = Cin * K
    nv = N * Lout                                   # valid output columns
    num_tiles = -(-nv // col_tile)
    P = num_tiles * col_tile                        # lane-dense padded width

    # ---- layout plumbing in the wrapper (XLA), not in the kernels ----
    x_t = jnp.transpose(x, (1, 0, 2))                                   # (Cin, N, L)
    cols = jnp.stack([x_t[:, :, k:k + Lout] for k in range(K)], axis=1)  # (Cin, K, N, Lout)
    cols = cols.reshape(CinK, nv)
    cols = jnp.pad(cols, ((0, 0), (0, P - nv))).astype(matmul_dtype)     # (CinK, P)
    w2 = w.reshape(Cout, CinK).astype(matmul_dtype)                      # (Cout, CinK)

    itemsize = jnp.dtype(matmul_dtype).itemsize
    cost = pl.CostEstimate(
        flops=2 * Cout * CinK * P,
        transcendentals=0,
        bytes_accessed=CinK * P * itemsize + Cout * CinK * itemsize + Cout * P * 4)

    # ---- pass 1: conv GEMM + per-channel stats (reduction axis = column tiles) ----
    y, s1, s2 = pl.pallas_call(
        conv_stats_kernel,
        out_shape=(jax.ShapeDtypeStruct((Cout, P), jnp.float32),
                   jax.ShapeDtypeStruct((Cout, 1), jnp.float32),
                   jax.ShapeDtypeStruct((Cout, 1), jnp.float32)),
        grid=(num_tiles,),
        in_specs=[pl.BlockSpec((Cout, CinK), lambda j: (0, 0)),      # weights resident
                  pl.BlockSpec((CinK, col_tile), lambda j: (0, j))],  # column tile
        out_specs=(pl.BlockSpec((Cout, col_tile), lambda j: (0, j)),
                   pl.BlockSpec((Cout, 1), lambda j: (0, 0)),         # sum accumulator
                   pl.BlockSpec((Cout, 1), lambda j: (0, 0))),        # sumsq accumulator
        compiler_params=pltpu.CompilerParams(dimension_semantics=("arbitrary",)),
        cost_estimate=cost,
    )(w2, cols)

    # ---- pass 2: folded BatchNorm + ReLU, tiles independent ----
    params = jnp.stack([gamma, beta], axis=1).astype(jnp.float32)    # (Cout, 2) packed
    out_flat = pl.pallas_call(
        functools.partial(bn_relu_kernel, inv_count=1.0 / float(nv)),
        out_shape=jax.ShapeDtypeStruct((Cout, P), jnp.float32),
        grid=(num_tiles,),
        in_specs=[pl.BlockSpec((Cout, col_tile), lambda j: (0, j)),
                  pl.BlockSpec((Cout, 1), lambda j: (0, 0)),
                  pl.BlockSpec((Cout, 1), lambda j: (0, 0)),
                  pl.BlockSpec((Cout, 2), lambda j: (0, 0))],
        out_specs=pl.BlockSpec((Cout, col_tile), lambda j: (0, j)),
        compiler_params=pltpu.CompilerParams(dimension_semantics=("parallel",)),
    )(y, s1, s2, params)

    # Restore NCL layout outside the kernel (free layout plumbing).
    return jnp.transpose(out_flat[:, :nv].reshape(Cout, N, Lout), (1, 0, 2))


def reference_forward(x, w, b, gamma, beta):
    """Pure-JAX reference matching PyTorch Conv1d + BatchNorm1d(train) + ReLU."""
    y = lax.conv_general_dilated(
        x, w, window_strides=(1,), padding="VALID",
        dimension_numbers=("NCW", "OIW", "NCW"),
        precision=lax.Precision.HIGHEST)
    y = y + b[None, :, None]
    mean = jnp.mean(y, axis=(0, 2), keepdims=True)
    var = jnp.mean((y - mean) ** 2, axis=(0, 2), keepdims=True)
    y = (y - mean) * lax.rsqrt(var + EPS)
    y = y * gamma[None, :, None] + beta[None, :, None]
    return jnp.maximum(y, 0.0)


if __name__ == "__main__":
    # Small shapes consistent with conv_layer(in_channels=4, out_channels=8)
    N, Cin, Cout, L, K = 2, 4, 8, 16, 3

    key = jax.random.PRNGKey(0)
    kx, kw, kb = jax.random.split(key, 3)

    x = jax.random.normal(kx, (N, Cin, L), dtype=jnp.float32)
    bound = 1.0 / jnp.sqrt(Cin * K)
    w = jax.random.uniform(kw, (Cout, Cin, K), jnp.float32, -bound, bound)
    b = jax.random.uniform(kb, (Cout,), jnp.float32, -bound, bound)
    gamma = jnp.ones((Cout,), jnp.float32)   # BatchNorm1d default weight
    beta = jnp.zeros((Cout,), jnp.float32)   # BatchNorm1d default bias

    ref = jax.block_until_ready(reference_forward(x, w, b, gamma, beta))

    # f32 matmul path: tight check of the kernel semantics.
    out_f32 = jax.block_until_ready(
        conv_layer_forward(x, w, b, gamma, beta, matmul_dtype=jnp.float32))
    assert out_f32.shape == (N, Cout, L - K + 1)
    assert jnp.allclose(out_f32, ref, rtol=1e-4, atol=1e-4)

    # Default bf16 MXU path: looser tolerance reflects bf16 input quantization only.
    out_bf16 = jax.block_until_ready(conv_layer_forward(x, w, b, gamma, beta))
    assert out_bf16.shape == (N, Cout, L - K + 1)
    assert jnp.allclose(out_bf16, ref, rtol=2e-2, atol=2e-2)

    print("KERNEL_OK")
</pallas_src>

<mosaic_0001>
module attributes {stable_mosaic.version = 11 : i64} {
  func.func @conv_stats_kernel(%arg0: i32, %arg1: memref<8x12xf32, #tpu.memory_space<vmem>>, %arg2: memref<12x128xf32, #tpu.memory_space<vmem>>, %arg3: memref<8x128xf32, #tpu.memory_space<vmem>>, %arg4: memref<8x1xf32, #tpu.memory_space<vmem>>, %arg5: memref<8x1xf32, #tpu.memory_space<vmem>>) attributes {dimension_semantics = [#tpu.dimension_semantics<arbitrary>], iteration_bounds = array<i64: 1>, scalar_prefetch = 0 : i64, scratch_operands = 0 : i64, tpu.core_type = #tpu.core_type<tc>, window_params = [{pipeline_mode = #tpu.pipeline_mode<synchronous>, transform_indices = @transform_0, window_bounds = array<i64: 8, 12>}, {transform_indices = @transform_1, window_bounds = array<i64: 12, 128>}, {transform_indices = @transform_2, window_bounds = array<i64: 8, 128>}, {pipeline_mode = #tpu.pipeline_mode<synchronous>, transform_indices = @transform_3, window_bounds = array<i64: 8, 1>}, {pipeline_mode = #tpu.pipeline_mode<synchronous>, transform_indices = @transform_4, window_bounds = array<i64: 8, 1>}]} {
    %c0 = arith.constant 0 : index
    %c0_0 = arith.constant 0 : index
    %0 = vector.load %arg1[%c0, %c0_0] : memref<8x12xf32, #tpu.memory_space<vmem>>, vector<8x12xf32>
    %c0_1 = arith.constant 0 : index
    %c0_2 = arith.constant 0 : index
    %1 = vector.load %arg2[%c0_1, %c0_2] : memref<12x128xf32, #tpu.memory_space<vmem>>, vector<12x128xf32>
    %cst = arith.constant dense<0.000000e+00> : vector<8x128xf32>
    %2 = tpu.matmul %0, %1, %cst {dimension_numbers = #tpu.dot_dimension_numbers<[1], [0], [0], [1], [0, 0, 1, 1], [], []>, precision = #tpu.contract_precision<fp32>} : vector<8x12xf32>, vector<12x128xf32>, vector<8x128xf32> -> vector<8x128xf32>
    %c0_3 = arith.constant 0 : index
    %c0_4 = arith.constant 0 : index
    %3 = vector.load %arg3[%c0_3, %c0_4] : memref<8x128xf32, #tpu.memory_space<vmem>>, vector<8x128xf32>
    tpu.vector_store %arg3[%c0_3, %c0_4], %2 {strides = array<i32>} : memref<8x128xf32, #tpu.memory_space<vmem>>, vector<8x128xf32>,
    %c0_i32 = arith.constant 0 : i32
    %4 = arith.cmpi eq, %arg0, %c0_i32 : i32
    %5 = arith.extui %4 : i1 to i32
    %c0_i32_5 = arith.constant 0 : i32
    %6 = arith.cmpi ne, %5, %c0_i32_5 : i32
    scf.if %6 {
      %cst_16 = arith.constant 0.000000e+00 : f32
      %18 = vector.broadcast %cst_16 : f32 to vector<8x1xf32>
      %c0_17 = arith.constant 0 : index
      %c0_18 = arith.constant 0 : index
      %19 = vector.load %arg4[%c0_17, %c0_18] : memref<8x1xf32, #tpu.memory_space<vmem>>, vector<8x1xf32>
      tpu.vector_store %arg4[%c0_17, %c0_18], %18 {strides = array<i32>} : memref<8x1xf32, #tpu.memory_space<vmem>>, vector<8x1xf32>,
      %cst_19 = arith.constant 0.000000e+00 : f32
      %20 = vector.broadcast %cst_19 : f32 to vector<8x1xf32>
      %c0_20 = arith.constant 0 : index
      %c0_21 = arith.constant 0 : index
      %21 = vector.load %arg5[%c0_20, %c0_21] : memref<8x1xf32, #tpu.memory_space<vmem>>, vector<8x1xf32>
      tpu.vector_store %arg5[%c0_20, %c0_21], %20 {strides = array<i32>} : memref<8x1xf32, #tpu.memory_space<vmem>>, vector<8x1xf32>,
    } else {
    }
    %c0_6 = arith.constant 0 : index
    %c0_7 = arith.constant 0 : index
    %7 = vector.load %arg4[%c0_6, %c0_7] : memref<8x1xf32, #tpu.memory_space<vmem>>, vector<8x1xf32>
    %cst_8 = arith.constant dense<0.000000e+00> : vector<8xf32>
    %8 = vector.multi_reduction <add>, %2, %cst_8 [1] : vector<8x128xf32> to vector<8xf32>
    %9 = vector.shape_cast %8 : vector<8xf32> to vector<8x1xf32>
    %10 = arith.addf %7, %9 : vector<8x1xf32>
    %c0_9 = arith.constant 0 : index
    %c0_10 = arith.constant 0 : index
    %11 = vector.load %arg4[%c0_9, %c0_10] : memref<8x1xf32, #tpu.memory_space<vmem>>, vector<8x1xf32>
    tpu.vector_store %arg4[%c0_9, %c0_10], %10 {strides = array<i32>} : memref<8x1xf32, #tpu.memory_space<vmem>>, vector<8x1xf32>,
    %c0_11 = arith.constant 0 : index
    %c0_12 = arith.constant 0 : index
    %12 = vector.load %arg5[%c0_11, %c0_12] : memref<8x1xf32, #tpu.memory_space<vmem>>, vector<8x1xf32>
    %13 = arith.mulf %2, %2 : vector<8x128xf32>
    %cst_13 = arith.constant dense<0.000000e+00> : vector<8xf32>
    %14 = vector.multi_reduction <add>, %13, %cst_13 [1] : vector<8x128xf32> to vector<8xf32>
    %15 = vector.shape_cast %14 : vector<8xf32> to vector<8x1xf32>
    %16 = arith.addf %12, %15 : vector<8x1xf32>
    %c0_14 = arith.constant 0 : index
    %c0_15 = arith.constant 0 : index
    %17 = vector.load %arg5[%c0_14, %c0_15] : memref<8x1xf32, #tpu.memory_space<vmem>>, vector<8x1xf32>
    tpu.vector_store %arg5[%c0_14, %c0_15], %16 {strides = array<i32>} : memref<8x1xf32, #tpu.memory_space<vmem>>, vector<8x1xf32>,
    return
  }
  func.func @transform_0(%arg0: i32) -> (i32, i32) {
    %c0_i32 = arith.constant 0 : i32
    %c0_i32_0 = arith.constant 0 : i32
    %c0_i32_1 = arith.constant 0 : i32
    return %c0_i32, %c0_i32_0 : i32, i32
  }
  func.func @transform_1(%arg0: i32) -> (i32, i32) {
    %c0_i32 = arith.constant 0 : i32
    %c0_i32_0 = arith.constant 0 : i32
    return %c0_i32, %arg0 : i32, i32
  }
  func.func @transform_2(%arg0: i32) -> (i32, i32) {
    %c0_i32 = arith.constant 0 : i32
    %c0_i32_0 = arith.constant 0 : i32
    return %c0_i32, %arg0 : i32, i32
  }
  func.func @transform_3(%arg0: i32) -> (i32, i32) {
    %c0_i32 = arith.constant 0 : i32
    %c0_i32_0 = arith.constant 0 : i32
    %c0_i32_1 = arith.constant 0 : i32
    return %c0_i32, %c0_i32_0 : i32, i32
  }
  func.func @transform_4(%arg0: i32) -> (i32, i32) {
    %c0_i32 = arith.constant 0 : i32
    %c0_i32_0 = arith.constant 0 : i32
    %c0_i32_1 = arith.constant 0 : i32
    return %c0_i32, %c0_i32_0 : i32, i32
  }
}

</mosaic_0001>

<bundles_post_ra>
// kernel: tpu_custom_call.1
= control target key start
LH: loop header
LB: loop body
LE: loop exit
PB: predicated region body
PF: predicated region fallthrough
CT: control target
= control target key end

     0   :  { %10 = vsyncpa [#allocation3], 0  ;;  %s826_s0 = inlined_call_operand.hbm [shape: f32[8,12], index: 0, kind: input, shape index: {}]   ;;  %s827_s1 = inlined_call_operand.hbm [shape: f32[12,128], index: 1, kind: input, shape index: {}]   ;;  %s828_s2 = inlined_call_operand.hbm [shape: f32[8,128], index: 2, kind: output, shape index: {0}]   ;;  %s829_s3 = inlined_call_operand.vmem [shape: f32[8,1], index: 3, kind: output, shape index: {1}]   ;;  %s830_s4 = inlined_call_operand.vmem [shape: f32[8,1], index: 4, kind: output, shape index: {2}]  }
   0x1   :  { %11 = vsyncpa [#allocation6], 0 }
   0x2   :  { %12 = vsyncpa [#allocation4], 0  ;;  %s722_s15 = smov [#allocation2]   ;;  %s723_s17 = smov [#allocation5]  }
   0x3   :  { %s19_s16 = sshll.u32 %s722_s15, 4  ;;  %s28_s18 = sshll.u32 %s723_s17, 4  ;;  %s20_s16 = int_to_ptr.vmem [resolvable:$true] %s19_s16  ;;  %s755_s18 = int_to_ptr.vmem [resolvable:$true] %s28_s18 }
   0x4   :  { %s650_s21 = scalar_lea.hbm %s826_s0, 128 }
   0x5   :  { %p651_p0 = scmp.ne.s32.totalorder %s826_s0, %s650_s21  ;;  %p654_p1 = scmp.lt.u32.totalorder %s650_s21, %s826_s0 }
   0x7   :  { %p656_p2 = pnand %p654_p1, %p651_p0 }
   0x9   :  { %659 = shalt.err (!%p656_p2)
}
   0xa   :  { %s660_s26 = scalar_lea.vmem %s20_s16, 128  ;;  %p665_p4 = scmp.lt.s32.totalorder %s20_s16, %s20_s16 }
   0xb   :  { %p661_p3 = scmp.ne.s32.totalorder %s20_s16, %s660_s26  ;;  %p666_p5 = scmp.lt.s32.totalorder %s660_s26, %s660_s26 }
   0xd   :  { %p667_p6 = por %p666_p5, %p665_p4 }
   0xf   :  { %p668_p7 = pnand %p667_p6, %p661_p3 }
  0x11   :  { %671 = shalt.err (!%p668_p7)
}
  0x12   :  { %22 = dma.hbm_to_vmem [thread:$0]  %s826_s0, 128, %s20_s16, [#allocation3]  }
  0x13   :  { %s672_s5 = scalar_lea.hbm %s827_s1, 256 }
  0x14   :  { %p673_p8 = scmp.ne.s32.totalorder %s827_s1, %s672_s5  ;;  %p676_p9 = scmp.lt.u32.totalorder %s672_s5, %s827_s1 }
  0x16   :  { %p678_p10 = pnand %p676_p9, %p673_p8 }
  0x18   :  { %681 = shalt.err (!%p678_p10)
}
  0x19   :  { %s682_s10 = scalar_lea.vmem %s755_s18, 256  ;;  %p687_p12 = scmp.lt.s32.totalorder %s755_s18, %s755_s18 }
  0x1a   :  { %p683_p11 = scmp.ne.s32.totalorder %s755_s18, %s682_s10  ;;  %p688_p13 = scmp.lt.s32.totalorder %s682_s10, %s682_s10 }
  0x1c   :  { %p689_p0 = por %p688_p13, %p687_p12 }
  0x1e   :  { %p690_p1 = pnand %p689_p0, %p683_p11 }
  0x20   :  { %693 = shalt.err (!%p690_p1)
}
  0x21   :  { %s724_s0 = smov 128   ;;  %s725_s11 = smov 8  }
  0x22   :  { %34 = dma.hbm_to_vmem [thread:$0]  %s827_s1, 256, %s755_s18, [#allocation6], %s724_s0, %s724_s0, %s725_s11  }
  0x23   :  { %716 = dma.done.wait [#allocation3], 128  }
  0x24   :  { %717 = vsyncadd [#allocation3], 4294967168 }
  0x25   :  { %718 = dma.done.wait [#allocation6], 256  }
  0x26   :  { %719 = vsyncadd [#allocation6], 4294967040  ;;  %v726_v0 = vmov 0.0|0.0   ;;  %vm727_vm0 = vmmov 0   ;;  %v728_v1 = vmov 0.0   ;;  %vm48_vm1 = vcmask 1043456  }
  0x27   :  { %624 = vmatprep.subr.bf16.mxu0 %v726_v0  ;;  %615 = vmatprep.subr.bf16.mxu1 %v726_v0  ;;  %vm44_vm2 = vcmask 97280   ;;  %v42_v2 = vld [vmem:[#allocation5] sm:$0xff]  ;;  %v43_v3 = vld [vmem:[#allocation5 + $0x8] sm:$0xf]  ;;  %v41_v4 = vld [vmem:[#allocation2] sm:$0xff]  ;;  %vm516_vm3 = vcmask 7168  }
  0x28   :  { %598 = vmatprep.mubr.msk.f32.mxu0 %vm727_vm0, %v728_v1  ;;  %577 = vmatprep.mubr.msk.f32.mxu1 %vm727_vm0, %v728_v1  ;;  %v50_v5 = vsel %vm48_vm1, %v43_v3, 0  ;;  %v53_v6 = vand.u32 4294901760, %v42_v2  ;;  %v46_v7 = vsel %vm44_vm2, %v41_v4, 0  ;;  %517 = vst.msk [vmem:[%s829_s3] sm:$0xff] %vm516_vm3, %v728_v1  ;;  %518 = vst.msk [vmem:[%s830_s4] sm:$0xff] %vm516_vm3, %v728_v1  ;;  %s729_s17 = smov [#allocation7]  }
  0x29   :  { %v56_v8 = vand.u32 4294901760, %v50_v5  ;;  %v119_v9 = vand.u32 4294901760, %v46_v7  ;;  %s537_s18 = sshll.u32 %s729_s17, 4  ;;  %s538_s18 = int_to_ptr.vmem [resolvable:$true] %s537_s18 }
  0x2a   :  { %v131_v10 = vsub.f32 %v42_v2, %v53_v6  ;;  %s694_s19 = scalar_lea.vmem %s538_s18, 128  ;;  %p699_p3 = scmp.lt.s32.totalorder %s538_s18, %s538_s18 }
  0x2b   :  { %v616_v11 = vpack.c.bf16 %v56_v8, %v53_v6  ;;  %v138_v12 = vsub.f32 %v50_v5, %v56_v8  ;;  %v120_v13 = vsub.f32 %v46_v7, %v119_v9  ;;  %p695_p2 = scmp.ne.s32.totalorder %s538_s18, %s694_s19  ;;  %p700_p4 = scmp.lt.s32.totalorder %s694_s19, %s694_s19 }
  0x2c   :  { %v132_v14 = vand.u32 4294901760, %v131_v10 }
  0x2d   :  { %626 = vmatpush3.bf16.msra.mxu0 %v616_v11  ;;  %617 = vmatpush3.bf16.msra.mxu1 %v616_v11  ;;  %v121_v15 = vand.u32 4294901760, %v120_v13  ;;  %v139_v16 = vand.u32 4294901760, %v138_v12  ;;  %v622_v25 = vpack.c.bf16 %v138_v12, %v131_v10  ;;  %p701_p5 = por %p700_p4, %p699_p3 }
  0x2e   :  { %618 = vmatprep.subr.bf16.mxu1 %v726_v0  ;;  %627 = vmatprep.subr.bf16.mxu0 %v726_v0  ;;  %v133_v17 = vsub.f32 %v131_v10, %v132_v14 }
  0x2f   :  { %v122_v18 = vsub.f32 %v120_v13, %v121_v15  ;;  %v140_v19 = vsub.f32 %v138_v12, %v139_v16  ;;  %v628_v20 = vpack.c.bf16 %v139_v16, %v132_v14  ;;  %p702_p6 = pnand %p701_p5, %p695_p2 }
  0x30   :  { %599 = vmatmul.mubr.f32.vlgmr.msra.gmra.mrb[0].mxu0 %v121_v15  ;;  %v134_v21 = vand.u32 4294901760, %v133_v17 }
  0x31   :  { %v123_v22 = vand.u32 4294901760, %v122_v18  ;;  %v141_v23 = vand.u32 4294901760, %v140_v19  ;;  %629 = vmatpush3.bf16.msra.mxu0 %v628_v20  ;;  %605 = vmatprep.mubr.msk.f32.mxu0 %vm727_vm0, %v728_v1 }
  0x32   :  { %630 = vmatprep.subr.bf16.mxu0 %v726_v0 }
  0x33   :  { %578 = vmatmul.mubr.f32.vlgmr.msra.gmra.mrb[0].mxu1 %v123_v22  ;;  %v619_v24 = vpack.c.bf16 %v141_v23, %v134_v21 }
  0x34   :  { %584 = vmatprep.mubr.msk.f32.mxu1 %vm727_vm0, %v728_v1 }
  0x35   :  { %620 = vmatpush3.bf16.msra.mxu1 %v619_v24 }
  0x36   :  { %621 = vmatprep.subr.bf16.mxu1 %v726_v0 }
  0x38   :  { %606 = vmatmul.mubr.f32.vlgmr.msra.gmra.mrb[0].mxu0 %v119_v9 }
  0x39   :  { %632 = vmatpush3.bf16.msra.mxu0 %v616_v11  ;;  %612 = vmatprep.mubr.msk.f32.mxu0 %vm727_vm0, %v728_v1 }
  0x3b   :  { %585 = vmatmul.mubr.f32.vlgmr.msra.gmra.mrb[0].mxu1 %v119_v9 }
  0x3c   :  { %623 = vmatpush3.bf16.msra.mxu1 %v622_v25  ;;  %591 = vmatprep.mubr.msk.f32.mxu1 %vm727_vm0, %v728_v1 }
  0x40   :  { %613 = vmatmul.mubr.f32.vlgmr.msra.gmra.mrb[0].mxu0 %v119_v9 }
  0x43   :  { %592 = vmatmul.mubr.f32.vlgmr.msra.gmra.mrb[0].mxu1 %v120_v13 }
 0x113   :  { %v507_v26 = vpop.f32.mrb[0].mxu0 }
 0x114   :  { %v614_v27 = vpop.f32.mrb[1].mxu0 }
 0x116   :  { %v282_v28 = vpop.f32.mrb[0].mxu1 }
 0x117   :  { %v633_v29 = vadd.f32 %v507_v26, %v282_v28  ;;  %v593_v30 = vpop.f32.mrb[1].mxu1 }
 0x119   :  { %511 = vst [vmem:[#allocation7] sm:$0xff] %v633_v29  ;;  %520 = vadd.xlane.f32.xlu0 %v633_v29  ;;  %v526_v31 = vmul.f32 %v633_v29, %v633_v29 }
 0x11d   :  { %527 = vadd.xlane.f32.xlu0 %v526_v31 }
 0x11e   :  { %705 = shalt.err (!%p702_p6)
}
 0x11f   :  { %s706_s22 = scalar_lea.hbm %s828_s2, 128 }
 0x120   :  { %p707_p7 = scmp.ne.s32.totalorder %s828_s2, %s706_s22  ;;  %p710_p8 = scmp.lt.u32.totalorder %s706_s22, %s828_s2 }
 0x122   :  { %p712_p9 = pnand %p710_p8, %p707_p7 }
 0x124   :  { %715 = shalt.err (!%p712_p9)
}
 0x125   :  { %540 = dma.vmem_to_hbm [thread:$0]  %s538_s18, 128, %s828_s2, [#allocation4]   ;;  %v519_v32 = vld [vmem:[%s829_s3] sm:$0xff] }
 0x126   :  { %v525_v35 = vld [vmem:[%s830_s4] sm:$0xff] }
 0x1a6   :  { %v521_v33 = vpop.xlane.xlu0 %520 }
 0x1a7   :  { %v522_v34 = vadd.f32 %v521_v33, %v519_v32 }
 0x1a9   :  { %524 = vst.msk [vmem:[%s829_s3] sm:$0xff] %vm516_vm3, %v522_v34 }
 0x1aa   :  { %v528_v36 = vpop.xlane.xlu0 %527 }
 0x1ab   :  { %v529_v37 = vadd.f32 %v528_v36, %v525_v35 }
 0x1ad   :  { %530 = vst.msk [vmem:[%s830_s4] sm:$0xff] %vm516_vm3, %v529_v37 }
 0x1ae   :  { %720 = dma.done.wait [#allocation4], 128  }
 0x1af   :  { %721 = vsyncadd [#allocation4], 4294967168 }
 0x1b0   :  { %552 = vsyncpa [#allocation3], 1 }
 0x1b1   :  { %553 = vsyncpa [#allocation6], 1 }
 0x1b2   :  { %554 = vsyncpa [#allocation4], 1 }

</bundles_post_ra>
